<compile_context>
chip_gen: v5e
topology: v5e:2x2
jax: 0.10.0
libtpu: 0.0.40
codegen_flags: <defaults>
</compile_context>

<pallas_src>
import math

import jax
import jax.numpy as jnp
from jax.experimental import pallas as pl
from jax.experimental.pallas import tpu as pltpu


def _timestep_embedding_kernel(x_ref, w1_ref, b1_ref, w2_ref, b2_ref, o_ref):
    # linear_1: [tm, Cin](bf16) @ [Cin, D](bf16) -> f32 accumulate, + f32 bias
    h = jnp.dot(x_ref[...], w1_ref[...], preferred_element_type=jnp.float32)
    h = h + b1_ref[...]
    # SiLU: x * sigmoid(x). jax.nn.sigmoid lowers exp/recip onto the EUP slot.
    h = h * jax.nn.sigmoid(h)
    # Deliberate cast back to the MXU compute dtype (bf16) for the second dot.
    h = h.astype(w2_ref.dtype)
    # linear_2: [tm, D](bf16) @ [D, Dout](bf16) -> f32 accumulate, + f32 bias
    y = jnp.dot(h, w2_ref[...], preferred_element_type=jnp.float32)
    y = y + b2_ref[...]
    o_ref[...] = y.astype(o_ref.dtype)


def timestep_embedding(sample, w1, b1, w2, b2, *, tm=256,
                       compute_dtype=jnp.bfloat16):
    """sample: [B, Cin]; w1: [Cin, D]; b1: [D]; w2: [D, Dout]; b2: [Dout].

    Matmuls run with `compute_dtype` MXU inputs and f32 accumulation.
    Output dtype matches `sample.dtype`.
    """
    B, Cin = sample.shape
    D = w1.shape[1]
    Dout = w2.shape[1]
    assert w1.shape == (Cin, D)
    assert w2.shape == (D, Dout)
    assert b1.shape == (D,) and b2.shape == (Dout,)

    # --- M tiling: round B up to a multiple of 8 (sublane), cap tile at tm. ---
    b_pad = ((B + 7) // 8) * 8
    tm = min(tm, b_pad)
    b_pad = ((b_pad + tm - 1) // tm) * tm
    grid_m = b_pad // tm

    x = sample.astype(compute_dtype)
    if b_pad != B:
        x = jnp.pad(x, ((0, b_pad - B), (0, 0)))

    w1c = w1.astype(compute_dtype)
    w2c = w2.astype(compute_dtype)
    b1_2d = b1.astype(jnp.float32).reshape(1, D)
    b2_2d = b2.astype(jnp.float32).reshape(1, Dout)

    # Weights/biases: constant block index -> stay resident in VMEM across the
    # M grid; only the activation/output tiles stream.
    # NOTE: for the real diffusers config (Cin=320, D=Dout=1280) the bf16
    # weights are ~4.1 MiB + double-buffered x/out tiles -> comfortably under
    # the 32 MiB default scoped VMEM on v6e/v7x; re-budget before enlarging tm.
    out_padded = pl.pallas_call(
        _timestep_embedding_kernel,
        out_shape=jax.ShapeDtypeStruct((b_pad, Dout), sample.dtype),
        grid=(grid_m,),
        in_specs=[
            pl.BlockSpec((tm, Cin), lambda i: (i, 0)),
            pl.BlockSpec((Cin, D), lambda i: (0, 0)),
            pl.BlockSpec((1, D), lambda i: (0, 0)),
            pl.BlockSpec((D, Dout), lambda i: (0, 0)),
            pl.BlockSpec((1, Dout), lambda i: (0, 0)),
        ],
        out_specs=pl.BlockSpec((tm, Dout), lambda i: (i, 0)),
        compiler_params=pltpu.CompilerParams(
            dimension_semantics=("parallel",),
        ),
    )(x, w1c, b1_2d, w2c, b2_2d)

    return out_padded[:B] if b_pad != B else out_padded


def _torch_linear_init(key, fan_in, fan_out, dtype=jnp.float32):
    """Deterministic init matching nn.Linear's U(-1/sqrt(fan_in), ...).

    Returns (W transposed to [fan_in, fan_out], b of [fan_out]).
    """
    kw, kb = jax.random.split(key)
    bound = 1.0 / math.sqrt(fan_in)
    w = jax.random.uniform(kw, (fan_in, fan_out), dtype, -bound, bound)
    b = jax.random.uniform(kb, (fan_out,), dtype, -bound, bound)
    return w, b


def _reference_same_precision(sample, w1, b1, w2, b2, compute_dtype):
    """Pure-JAX reference following the same bf16-in / f32-acc path."""
    xb = sample.astype(compute_dtype)
    h = jnp.dot(xb, w1.astype(compute_dtype),
                preferred_element_type=jnp.float32) + b1
    h = h * jax.nn.sigmoid(h)
    y = jnp.dot(h.astype(compute_dtype), w2.astype(compute_dtype),
                preferred_element_type=jnp.float32) + b2
    return y.astype(sample.dtype)


def _reference_f32(sample, w1, b1, w2, b2):
    h = sample @ w1 + b1
    h = h * jax.nn.sigmoid(h)
    return h @ w2 + b2


if __name__ == "__main__":
    # Module config: in_channels=32, time_embed_dim=128, out_dim=None.
    batch = 8
    in_channels = 32
    time_embed_dim = 128

    key = jax.random.PRNGKey(0)
    k_x, k_l1, k_l2 = jax.random.split(key, 3)

    sample = jax.random.normal(k_x, (batch, in_channels), jnp.float32)
    w1, b1 = _torch_linear_init(k_l1, in_channels, time_embed_dim)
    w2, b2 = _torch_linear_init(k_l2, time_embed_dim, time_embed_dim)

    out = timestep_embedding(sample, w1, b1, w2, b2)
    jax.block_until_ready(out)
    assert out.shape == (batch, time_embed_dim)

    # Exact-path check (same bf16/f32 mixed precision as the kernel).
    ref_same = _reference_same_precision(sample, w1, b1, w2, b2, jnp.bfloat16)
    assert jnp.allclose(out, ref_same, atol=1e-3, rtol=1e-3), \
        "mismatch vs same-precision reference"

    # Loose sanity check vs full-f32 math (bf16 weight rounding error only).
    ref_f32 = _reference_f32(sample, w1, b1, w2, b2)
    assert jnp.allclose(out, ref_f32, atol=5e-2, rtol=5e-2), \
        "mismatch vs f32 reference"

    print("KERNEL_OK")
</pallas_src>

<mosaic_0001>
module attributes {stable_mosaic.version = 11 : i64} {
  func.func @_timestep_embedding_kernel(%arg0: i32, %arg1: memref<8x32xbf16, #tpu.memory_space<vmem>>, %arg2: memref<32x128xbf16, #tpu.memory_space<vmem>>, %arg3: memref<1x128xf32, #tpu.memory_space<vmem>>, %arg4: memref<128x128xbf16, #tpu.memory_space<vmem>>, %arg5: memref<1x128xf32, #tpu.memory_space<vmem>>, %arg6: memref<8x128xf32, #tpu.memory_space<vmem>>) attributes {dimension_semantics = [#tpu.dimension_semantics<parallel>], iteration_bounds = array<i64: 1>, scalar_prefetch = 0 : i64, scratch_operands = 0 : i64, tpu.core_type = #tpu.core_type<tc>, window_params = [{transform_indices = @transform_0, window_bounds = array<i64: 8, 32>}, {pipeline_mode = #tpu.pipeline_mode<synchronous>, transform_indices = @transform_1, window_bounds = array<i64: 32, 128>}, {pipeline_mode = #tpu.pipeline_mode<synchronous>, transform_indices = @transform_2, window_bounds = array<i64: 1, 128>}, {pipeline_mode = #tpu.pipeline_mode<synchronous>, transform_indices = @transform_3, window_bounds = array<i64: 128, 128>}, {pipeline_mode = #tpu.pipeline_mode<synchronous>, transform_indices = @transform_4, window_bounds = array<i64: 1, 128>}, {transform_indices = @transform_5, window_bounds = array<i64: 8, 128>}]} {
    %c0 = arith.constant 0 : index
    %c0_0 = arith.constant 0 : index
    %0 = vector.load %arg1[%c0, %c0_0] : memref<8x32xbf16, #tpu.memory_space<vmem>>, vector<8x32xbf16>
    %c0_1 = arith.constant 0 : index
    %c0_2 = arith.constant 0 : index
    %1 = vector.load %arg2[%c0_1, %c0_2] : memref<32x128xbf16, #tpu.memory_space<vmem>>, vector<32x128xbf16>
    %cst = arith.constant dense<0.000000e+00> : vector<8x128xf32>
    %2 = tpu.matmul %0, %1, %cst {dimension_numbers = #tpu.dot_dimension_numbers<[1], [0], [0], [1], [0, 0, 1, 1], [], []>} : vector<8x32xbf16>, vector<32x128xbf16>, vector<8x128xf32> -> vector<8x128xf32>
    %c0_3 = arith.constant 0 : index
    %c0_4 = arith.constant 0 : index
    %3 = vector.load %arg3[%c0_3, %c0_4] : memref<1x128xf32, #tpu.memory_space<vmem>>, vector<1x128xf32>
    %4 = vector.broadcast %3 : vector<1x128xf32> to vector<8x128xf32>
    %5 = arith.addf %2, %4 : vector<8x128xf32>
    %6 = arith.negf %5 : vector<8x128xf32>
    %7 = math.exp %6 : vector<8x128xf32>
    %cst_5 = arith.constant 1.000000e+00 : f32
    %8 = vector.broadcast %cst_5 : f32 to vector<8x128xf32>
    %9 = arith.addf %8, %7 : vector<8x128xf32>
    %10 = arith.divf %8, %9 : vector<8x128xf32>
    %11 = arith.mulf %5, %10 : vector<8x128xf32>
    %12 = arith.truncf %11 : vector<8x128xf32> to vector<8x128xbf16>
    %c0_6 = arith.constant 0 : index
    %c0_7 = arith.constant 0 : index
    %13 = vector.load %arg4[%c0_6, %c0_7] : memref<128x128xbf16, #tpu.memory_space<vmem>>, vector<128x128xbf16>
    %cst_8 = arith.constant dense<0.000000e+00> : vector<8x128xf32>
    %14 = tpu.matmul %12, %13, %cst_8 {dimension_numbers = #tpu.dot_dimension_numbers<[1], [0], [0], [1], [0, 0, 1, 1], [], []>} : vector<8x128xbf16>, vector<128x128xbf16>, vector<8x128xf32> -> vector<8x128xf32>
    %c0_9 = arith.constant 0 : index
    %c0_10 = arith.constant 0 : index
    %15 = vector.load %arg5[%c0_9, %c0_10] : memref<1x128xf32, #tpu.memory_space<vmem>>, vector<1x128xf32>
    %16 = vector.broadcast %15 : vector<1x128xf32> to vector<8x128xf32>
    %17 = arith.addf %14, %16 : vector<8x128xf32>
    %c0_11 = arith.constant 0 : index
    %c0_12 = arith.constant 0 : index
    %18 = vector.load %arg6[%c0_11, %c0_12] : memref<8x128xf32, #tpu.memory_space<vmem>>, vector<8x128xf32>
    tpu.vector_store %arg6[%c0_11, %c0_12], %17 {strides = array<i32>} : memref<8x128xf32, #tpu.memory_space<vmem>>, vector<8x128xf32>,
    return
  }
  func.func @transform_0(%arg0: i32) -> (i32, i32) {
    %c0_i32 = arith.constant 0 : i32
    %c0_i32_0 = arith.constant 0 : i32
    return %arg0, %c0_i32 : i32, i32
  }
  func.func @transform_1(%arg0: i32) -> (i32, i32) {
    %c0_i32 = arith.constant 0 : i32
    %c0_i32_0 = arith.constant 0 : i32
    %c0_i32_1 = arith.constant 0 : i32
    return %c0_i32, %c0_i32_0 : i32, i32
  }
  func.func @transform_2(%arg0: i32) -> (i32, i32) {
    %c0_i32 = arith.constant 0 : i32
    %c0_i32_0 = arith.constant 0 : i32
    %c0_i32_1 = arith.constant 0 : i32
    return %c0_i32, %c0_i32_0 : i32, i32
  }
  func.func @transform_3(%arg0: i32) -> (i32, i32) {
    %c0_i32 = arith.constant 0 : i32
    %c0_i32_0 = arith.constant 0 : i32
    %c0_i32_1 = arith.constant 0 : i32
    return %c0_i32, %c0_i32_0 : i32, i32
  }
  func.func @transform_4(%arg0: i32) -> (i32, i32) {
    %c0_i32 = arith.constant 0 : i32
    %c0_i32_0 = arith.constant 0 : i32
    %c0_i32_1 = arith.constant 0 : i32
    return %c0_i32, %c0_i32_0 : i32, i32
  }
  func.func @transform_5(%arg0: i32) -> (i32, i32) {
    %c0_i32 = arith.constant 0 : i32
    %c0_i32_0 = arith.constant 0 : i32
    return %arg0, %c0_i32 : i32, i32
  }
}

</mosaic_0001>

<bundles_post_ra>
// kernel: tpu_custom_call.1
= control target key start
LH: loop header
LB: loop body
LE: loop exit
PB: predicated region body
PF: predicated region fallthrough
CT: control target
= control target key end

     0   :  { %10 = vsyncpa [#allocation3], 0  ;;  %s446_s0 = inlined_call_operand.hbm [shape: bf16[8,32], index: 0, kind: input, shape index: {}]   ;;  %s447_s1 = inlined_call_operand.hbm [shape: bf16[32,128], index: 1, kind: input, shape index: {}]   ;;  %s448_s2 = inlined_call_operand.vmem [shape: f32[1,128], index: 2, kind: input, shape index: {}]   ;;  %s449_s3 = inlined_call_operand.hbm [shape: bf16[128,128], index: 3, kind: input, shape index: {}]   ;;  %s450_s4 = inlined_call_operand.vmem [shape: f32[1,128], index: 4, kind: input, shape index: {}]   ;;  %s451_s5 = inlined_call_operand.hbm [shape: f32[8,128], index: 5, kind: output, shape index: {}]  }
   0x1   :  { %11 = vsyncpa [#allocation6], 0  ;;  %s28_s20 = sshll.u32 %s447_s1, 4  ;;  %s29_s20 = int_to_ptr.hbm [resolvable:$true] %s28_s20 }
   0x2   :  { %12 = vsyncpa [#allocation4], 0  ;;  %s392_s21 = smov [#allocation5]   ;;  %s18_s25 = sshll.u32 %s446_s0, 4  ;;  %s19_s25 = int_to_ptr.hbm [resolvable:$true] %s18_s25 }
   0x3   :  { %s30_s22 = sshll.u32 %s392_s21, 4  ;;  %s393_s26 = smov 64   ;;  %s31_s22 = int_to_ptr.vmem [resolvable:$true] %s30_s22 }
   0x4   :  { %s394_s27 = smov 4   ;;  %s395_s28 = smov [#allocation2]  }
   0x5   :  { %36 = dma.hbm_to_vmem [thread:$0]  %s29_s20, 256, %s31_s22, [#allocation6], %s393_s26, %s393_s26, %s394_s27  }
   0x6   :  { %s20_s29 = sshll.u32 %s395_s28, 4  ;;  %s43_s7 = sshll.u32 %s449_s3, 4  ;;  %s21_s29 = int_to_ptr.vmem [resolvable:$true] %s20_s29  ;;  %s44_s7 = int_to_ptr.hbm [resolvable:$true] %s43_s7 }
   0x7   :  { %23 = dma.hbm_to_vmem [thread:$0]  %s19_s25, 64, %s21_s29, [#allocation3]  }
   0x8   :  { %s396_s1 = smov [#allocation7]  }
   0x9   :  { %s45_s8 = sshll.u32 %s396_s1, 4  ;;  %s46_s8 = int_to_ptr.vmem [resolvable:$true] %s45_s8 }
   0xa   :  { %51 = dma.hbm_to_vmem [thread:$0]  %s44_s7, 1024, %s46_s8, [#allocation6], %s393_s26, %s393_s26, %s394_s27  }
   0xb   :  { %386 = dma.done.wait [#allocation3], 64  }
   0xc   :  { %387 = vsyncadd [#allocation3], 4294967232 }
   0xd   :  { %388 = dma.done.wait [#allocation6], 1280  }
   0xe   :  { %389 = vsyncadd [#allocation6], 4294966016  ;;  %v269_v0 = vld [vmem:[#allocation5 + $0x8] sm:$0xff]  ;;  %v268_v1 = vld [vmem:[#allocation5] sm:$0xff]  ;;  %vm88_vm0 = vcmask 261120   ;;  %s397_s10 = smov [#allocation8]  }
   0xf   :  { %98 = vmatpush.bf16.msra.mxu0 %v269_v0  ;;  %v67_v2 = vld [vmem:[#allocation2] sm:$0xf]  ;;  %v277_v3 = vld [vmem:[#allocation7 + $0x38] sm:$0xff]  ;;  %v276_v4 = vld [vmem:[#allocation7 + $0x30] sm:$0xff]  ;;  %s213_s11 = sshll.u32 %s397_s10, 4  ;;  %s215_s14 = sshll.u32 %s451_s5, 4  ;;  %s214_s11 = int_to_ptr.vmem [resolvable:$true] %s213_s11  ;;  %s216_s14 = int_to_ptr.hbm [resolvable:$true] %s215_s14 }
  0x10   :  { %194 = vmatpush.bf16.msra.mxu1 %v277_v3  ;;  %v275_v5 = vld [vmem:[#allocation7 + $0x28] sm:$0xff]  ;;  %v274_v6 = vld [vmem:[#allocation7 + $0x20] sm:$0xff]  ;;  %v273_v7 = vld [vmem:[#allocation7 + $0x18] sm:$0xff] }
  0x11   :  { %v272_v8 = vld [vmem:[#allocation7 + $0x10] sm:$0xff]  ;;  %v271_v9 = vld [vmem:[#allocation7 + $0x8] sm:$0xff]  ;;  %v270_v10 = vld [vmem:[#allocation7] sm:$0xff] }
  0x12   :  { %v284_v11 = vld [vmem:[%s448_s2] ss:$0 sm:$0xff] }
  0x13   :  { %99 = vmatpush.bf16.msra.mxu0 %v268_v1  ;;  %v285_v30 = vld [vmem:[%s450_s4] ss:$0 sm:$0xff] }
  0x14   :  { %195 = vmatpush.bf16.msra.mxu1 %v276_v4 }
  0x16   :  { %234 = vmatmul.msk.bf16.vlgmr.msra.gmra.mxu0 %vm88_vm0, %v67_v2 }
  0x18   :  { %196 = vmatpush.bf16.msra.mxu1 %v275_v5 }
  0x1c   :  { %197 = vmatpush.bf16.msra.mxu1 %v274_v6 }
  0x20   :  { %198 = vmatpush.bf16.msra.mxu1 %v273_v7 }
  0x24   :  { %199 = vmatpush.bf16.msra.mxu1 %v272_v8 }
  0x28   :  { %200 = vmatpush.bf16.msra.mxu1 %v271_v9 }
  0x2c   :  { %201 = vmatpush.bf16.msra.mxu1 %v270_v10 }
  0x93   :  { %v101_v12 = vpop.f32.mrf.mxu0 }
  0x94   :  { %v102_v13 = vadd.f32 %v284_v11, %v101_v12 }
  0x96   :  { %v235_v14 = vmul.f32 -1.442695, %v102_v13 }
  0x98   :  { %286 = vpow2.f32 %v235_v14 }
  0x9b   :  { %v103_v15 = vpop.f32.mrf.mxu0 }
  0x9e   :  { %v287_v16 = vpop.eup %286 }
  0x9f   :  { %v108_v17 = vadd.f32 1.0, %v287_v16 }
  0xa1   :  { %288 = vrcp.f32 %v108_v17  ;;  %v120_v21 = vand.u32 2147483648, %v108_v17  ;;  %v118_v23 = vand.u32 2147483647, %v108_v17  ;;  %vm114_vm2 = vweird.f32 %v108_v17 }
  0xa3   :  { %v121_v25 = vor.u32 1.1754944e-38, %v120_v21  ;;  %vm119_vm4 = vcmp.eq.f32.partialorder %v118_v23, 8.507059e+37 }
  0xa7   :  { %v289_v18 = vpop.eup %288 }
  0xa8   :  { %v110_v19 = vmul.f32 %v289_v18, %v108_v17  ;;  %vm115_vm1 = vweird.f32 %v289_v18 }
  0xa9   :  { %vm116_vm3 = vmor %vm114_vm2, %vm115_vm1 }
  0xaa   :  { %v111_v20 = vsub.f32 1.0, %v110_v19 }
  0xac   :  { %v112_v22 = vmul.f32 %v289_v18, %v111_v20 }
  0xae   :  { %v113_v24 = vadd.f32 %v289_v18, %v112_v22 }
  0xb0   :  { %v117_v26 = vsel %vm116_vm3, %v289_v18, %v113_v24 }
  0xb1   :  { %v122_v27 = vsel %vm119_vm4, %v121_v25, %v117_v26 }
  0xb2   :  { %v124_v28 = vmul.f32 %v122_v27, %v102_v13 }
  0xb4   :  { %v125_v29 = vpack.c.bf16 %v124_v28, %v124_v28 }
  0xb6   :  { %202 = vmatmul.bf16.vlgmr.msra.gmra.mxu1 %v125_v29 }
 0x133   :  { %v203_v31 = vpop.f32.mrf.mxu1 }
 0x134   :  { %v204_v32 = vadd.f32 %v285_v30, %v203_v31 }
 0x136   :  { %207 = vst [vmem:[#allocation8] sm:$0xff] %v204_v32 }
 0x137   :  { %218 = dma.vmem_to_hbm [thread:$0]  %s214_s11, 128, %s216_s14, [#allocation4]  }
 0x13b   :  { %v205_v33 = vpop.f32.mrf.mxu1 }
 0x13c   :  { %390 = dma.done.wait [#allocation4], 128  }
 0x13d   :  { %391 = vsyncadd [#allocation4], 4294967168 }
 0x13e   :  { %223 = vsyncpa [#allocation3], 1 }
 0x13f   :  { %224 = vsyncpa [#allocation6], 1 }
 0x140   :  { %225 = vsyncpa [#allocation4], 1 }

</bundles_post_ra>
